<compile_context>
chip_gen: v6e
topology: v6e:2x2x1
jax: 0.10.0
libtpu: 0.0.40
codegen_flags: <defaults>
</compile_context>

<pallas_src>
import math
import functools

import jax
import jax.numpy as jnp
from jax.experimental import pallas as pl
from jax.experimental.pallas import tpu as pltpu


# -----------------------------------------------------------------------------
# Pallas kernel
# -----------------------------------------------------------------------------
def _encoder_block_kernel(
    x_ref,      # (BB, S_pad, D) f32
    ln1g_ref,   # (1, D)   f32
    ln1b_ref,   # (1, D)   f32
    wqkv_ref,   # (D, 3D)  bf16 (Q columns pre-scaled by 1/sqrt(dh))
    bqkv_ref,   # (1, 3D)  f32  (Q part pre-scaled)
    wo_ref,     # (D, D)   bf16
    bo_ref,     # (1, D)   f32
    ln2g_ref,   # (1, D)   f32
    ln2b_ref,   # (1, D)   f32
    w1_ref,     # (D, TM)  bf16 (current MLP chunk)
    b1_ref,     # (1, TM)  f32
    w2_ref,     # (TM, D)  bf16 (current MLP chunk)
    b2_ref,     # (1, D)   f32
    o_ref,      # (BB, S_pad, D)
    x1_scr,     # (BB*S_pad, D) f32  : x + attention (residual 1)
    xn2_scr,    # (BB*S_pad, D) bf16 : LN2 output (MXU operand for the MLP)
    acc_scr,    # (BB*S_pad, D) f32  : MLP output accumulator
    attn_scr,   # (S_pad, D)    bf16 : per-row attention head outputs
    *,
    num_heads: int,
    seq_len: int,
    approx_gelu: bool,
):
    BB, S_pad, D = x_ref.shape
    H = num_heads
    dh = D // H
    eps = 1e-5
    bf16 = jnp.bfloat16
    f32 = jnp.float32
    m_idx = pl.program_id(1)
    last_m = pl.num_programs(1) - 1

    # ------------------- attention phase (only at the first MLP chunk) -------
    @pl.when(m_idx == 0)
    def _attention_phase():
        if S_pad != seq_len:
            # mask padded key columns out of the softmax
            col = jax.lax.broadcasted_iota(jnp.int32, (S_pad, S_pad), 1)
            key_mask = jnp.where(col >= seq_len, -1e30, 0.0).astype(f32)

        for bi in range(BB):                                  # static unroll
            x = x_ref[bi].astype(f32)                         # (S_pad, D)

            # LayerNorm 1 — centered two-pass variance.
            mu1 = jnp.mean(x, axis=-1, keepdims=True)
            xc = x - mu1
            var1 = jnp.mean(xc * xc, axis=-1, keepdims=True)
            xn1 = xc * jax.lax.rsqrt(var1 + eps) * ln1g_ref[0] + ln1b_ref[0]

            # QKV projection: bf16 operands, f32 accumulation on the MXU.
            qkv = jnp.dot(xn1.astype(bf16), wqkv_ref[...],
                          preferred_element_type=f32) + bqkv_ref[0]   # (S, 3D)
            qkv_bf = qkv.astype(bf16)                         # cast once

            for h in range(H):                                # static unroll
                qh = qkv_bf[:, h * dh:(h + 1) * dh]
                kh = qkv_bf[:, D + h * dh:D + (h + 1) * dh]
                vh = qkv_bf[:, 2 * D + h * dh:2 * D + (h + 1) * dh]
                # scores = q @ k^T (1/sqrt(dh) folded into W_q)
                s = jax.lax.dot_general(qh, kh, (((1,), (1,)), ((), ())),
                                        preferred_element_type=f32)    # (S, S)
                if S_pad != seq_len:
                    s = s + key_mask
                s = s - jnp.max(s, axis=-1, keepdims=True)
                p = jnp.exp(s)
                p = p * pl.reciprocal(jnp.sum(p, axis=-1, keepdims=True),
                                      approx=True)
                # TODO(synk): attention_dropout > 0 not modeled (eval -> identity)
                attn_scr[:, h * dh:(h + 1) * dh] = jnp.dot(
                    p.astype(bf16), vh,
                    preferred_element_type=f32).astype(bf16)

            attn = jnp.dot(attn_scr[...], wo_ref[...],
                           preferred_element_type=f32) + bo_ref[0]

            x1 = x + attn                                     # residual 1
            rows = pl.ds(bi * S_pad, S_pad)
            x1_scr[rows, :] = x1

            # LayerNorm 2 — centered two-pass; stored bf16 for the MLP matmuls.
            mu2 = jnp.mean(x1, axis=-1, keepdims=True)
            x1c = x1 - mu2
            var2 = jnp.mean(x1c * x1c, axis=-1, keepdims=True)
            xn2 = x1c * jax.lax.rsqrt(var2 + eps) * ln2g_ref[0] + ln2b_ref[0]
            xn2_scr[rows, :] = xn2.astype(bf16)

    # ------------------- MLP chunk over the hidden dim (every m) -------------
    h1 = jnp.dot(xn2_scr[...], w1_ref[...],
                 preferred_element_type=f32) + b1_ref[0]      # (BB*S_pad, TM)
    if approx_gelu:
        h1 = 0.5 * h1 * (1.0 + jnp.tanh(0.7978845608028654
                                        * (h1 + 0.044715 * h1 * h1 * h1)))
    else:
        # exact GELU (matches nn.GELU default)
        h1 = 0.5 * h1 * (1.0 + jax.lax.erf(h1 * (1.0 / math.sqrt(2.0))))
    # TODO(synk): mlp_dropout > 0 not modeled (eval mode -> identity)
    h2 = jnp.dot(h1.astype(bf16), w2_ref[...], preferred_element_type=f32)

    @pl.when(m_idx == 0)
    def _init_acc():
        acc_scr[...] = h2                                     # no zero+add pass

    @pl.when(m_idx > 0)
    def _accumulate():
        acc_scr[...] = acc_scr[...] + h2

    # ------------------- finalize (last MLP chunk) ----------------------------
    @pl.when(m_idx == last_m)
    def _finalize():
        for bi in range(BB):
            rows = pl.ds(bi * S_pad, S_pad)
            o_ref[bi] = (x1_scr[rows, :] + acc_scr[rows, :]
                         + b2_ref[0]).astype(o_ref.dtype)


# -----------------------------------------------------------------------------
# Generation-aware VMEM budget & tiling plan
# -----------------------------------------------------------------------------
def _vmem_budget_bytes():
    cap = None
    try:
        cap = int(pltpu.get_tpu_info().vmem_capacity_bytes)
    except Exception:
        cap = None
    if not cap or cap <= 0:
        cap = 64 * 1024 * 1024          # conservative (v7x-sized) fallback
    # ~25% headroom for pipeline double-buffers / internal scratch; never ask
    # for more than ~100 MiB even on 128-MiB parts.
    return min((cap * 3) // 4, 100 * 1024 * 1024)


def _divisors(n):
    return [d for d in range(1, n + 1) if n % d == 0]


def _plan(B, S, D, M, *, mlp_chunk=None, batch_block=None):
    """Returns (S_pad, TM, BB, num_m, vmem_budget)."""
    budget = _vmem_budget_bytes()
    S_pad = -(-S // 8) * 8

    const_w = 2 * 4 * D * D + 4 * (9 * D + 3 * D)   # wqkv+wo bf16, LN/bias f32
    full_mlp_w = 2 * 2 * D * M                      # w1+w2 bf16, single-buffered

    def overhead(bb, tm):
        persist = bb * S_pad * D * (4 + 2 + 4) + S_pad * D * 2   # x1/xn2/acc + attn scratch
        io = 2 * 2 * bb * S_pad * D * 4                          # x + out, double-buffered
        attn_tmp = S_pad * 3 * D * 6 + 2 * S_pad * S_pad * 4     # qkv (f32+bf16) + scores
        mlp_tmp = bb * S_pad * tm * 6                            # h1 f32 + bf16 copy
        return persist + io + attn_tmp + mlp_tmp

    # ---- MLP hidden-dim tiling: prefer full residency (weights DMA'd once) ----
    if mlp_chunk is not None:
        assert M % mlp_chunk == 0 and (mlp_chunk == M or mlp_chunk % 128 == 0)
        tm = mlp_chunk
    elif const_w + full_mlp_w + overhead(batch_block or 1, M) <= budget:
        tm = M
    else:
        tm = 128 if M % 128 == 0 else M
        for c in (2048, 1024, 512, 256, 128):
            if M % c == 0 and (const_w + 3 * 2 * 2 * D * c
                               + overhead(batch_block or 1, c)) <= budget:
                tm = c
                break
    num_m = M // tm

    # ---- batch blocking: only worth it when streaming MLP weight chunks ----
    if batch_block is not None:
        assert B % batch_block == 0
        bb = batch_block
    elif num_m == 1:
        bb = 1
    else:
        bb = 1
        for d in _divisors(B):
            if const_w + 3 * 2 * 2 * D * tm + overhead(d, tm) > budget:
                break
            bb = d
            if d * S_pad >= 256 and (B // d >= 2 or d == B):
                break

    return S_pad, tm, bb, num_m, budget


def _make_spec(shape, index_map, buffers=None):
    """BlockSpec with optional explicit buffer count (falls back gracefully)."""
    if buffers is not None and hasattr(pl, "Buffered"):
        try:
            return pl.BlockSpec(shape, index_map, pipeline_mode=pl.Buffered(buffers))
        except TypeError:
            pass
    return pl.BlockSpec(shape, index_map)


# -----------------------------------------------------------------------------
# Wrapper
# -----------------------------------------------------------------------------
def transformer_encoder_block(x, params, *, num_heads, mlp_chunk=None,
                              batch_block=None, approx_gelu=False):
    """x: (B, S, D) float32.  params: dict of weights (see init_params)."""
    B, S, D = x.shape
    M = params["w1"].shape[1]
    assert D % num_heads == 0
    dh = D // num_heads

    S_pad, TM, BB, num_m, budget = _plan(B, S, D, M, mlp_chunk=mlp_chunk,
                                         batch_block=batch_block)
    nB = B // BB

    # Fold the 1/sqrt(dh) attention scale into the Q projection (static fold).
    scale = 1.0 / math.sqrt(dh)
    w_qkv = params["w_qkv"].astype(jnp.float32).at[:, :D].multiply(scale)
    b_qkv = params["b_qkv"].astype(jnp.float32).at[:, :D].multiply(scale)

    # bf16 weights: native MXU dtype; halves VMEM residency and HBM DMA bytes.
    bf = jnp.bfloat16
    w_qkv_bf = w_qkv.astype(bf)
    w_o_bf = params["w_o"].astype(bf)
    w1_bf = params["w1"].astype(bf)
    w2_bf = params["w2"].astype(bf)

    # Pad S to a sublane-aligned extent (pad rows are masked / sliced off).
    x_p = x if S_pad == S else jnp.pad(x, ((0, 0), (0, S_pad - S), (0, 0)))

    kernel = functools.partial(_encoder_block_kernel, num_heads=num_heads,
                               seq_len=S, approx_gelu=approx_gelu)

    def const_spec(shape):
        # constant block index -> single buffer (no wasted double-buffer VMEM)
        return _make_spec(shape, lambda b, m: (0,) * len(shape), buffers=1)

    # Resident MLP weights: single-buffered. Streamed chunks: 3-deep pipeline
    # (attention phase at m==0 gives plenty of slack to prefetch ahead).
    w_buffers = 1 if num_m == 1 else 3

    in_specs = [
        pl.BlockSpec((BB, S_pad, D), lambda b, m: (b, 0, 0)),        # x
        const_spec((1, D)), const_spec((1, D)),                      # ln1 g/b
        const_spec((D, 3 * D)), const_spec((1, 3 * D)),              # w_qkv/b_qkv
        const_spec((D, D)), const_spec((1, D)),                      # w_o/b_o
        const_spec((1, D)), const_spec((1, D)),                      # ln2 g/b
        _make_spec((D, TM), lambda b, m: (0, m), buffers=w_buffers), # w1 chunk
        _make_spec((1, TM), lambda b, m: (0, m), buffers=w_buffers), # b1 chunk
        _make_spec((TM, D), lambda b, m: (m, 0), buffers=w_buffers), # w2 chunk
        const_spec((1, D)),                                          # b2
    ]

    out = pl.pallas_call(
        kernel,
        out_shape=jax.ShapeDtypeStruct((B, S_pad, D), x.dtype),
        grid_spec=pltpu.PrefetchScalarGridSpec(
            num_scalar_prefetch=0,
            grid=(nB, num_m),
            in_specs=in_specs,
            out_specs=pl.BlockSpec((BB, S_pad, D), lambda b, m: (b, 0, 0)),
            scratch_shapes=[
                pltpu.VMEM((BB * S_pad, D), jnp.float32),    # x1 (residual 1)
                pltpu.VMEM((BB * S_pad, D), jnp.bfloat16),   # LN2 output
                pltpu.VMEM((BB * S_pad, D), jnp.float32),    # MLP accumulator
                pltpu.VMEM((S_pad, D), jnp.bfloat16),        # attn head outputs
            ],
        ),
        compiler_params=pltpu.CompilerParams(
            dimension_semantics=("parallel", "arbitrary"),
            vmem_limit_bytes=int(budget),
        ),
    )(
        x_p,
        params["ln1_g"], params["ln1_b"],
        w_qkv_bf, b_qkv,
        w_o_bf, params["b_o"],
        params["ln2_g"], params["ln2_b"],
        w1_bf, params["b1"],
        w2_bf, params["b2"],
    )
    return out if S_pad == S else out[:, :S, :]


# -----------------------------------------------------------------------------
# Deterministic parameter init (synthetic weights, inference mode)
# -----------------------------------------------------------------------------
def init_params(key, embed_dim, mlp_size):
    D, M = embed_dim, mlp_size
    ks = jax.random.split(key, 12)
    std = 0.02

    def n(k, shape):
        return (std * jax.random.normal(k, shape)).astype(jnp.float32)

    return {
        "ln1_g": 1.0 + n(ks[0], (1, D)),
        "ln1_b": n(ks[1], (1, D)),
        # stored pre-transposed so the kernel computes x @ W + b
        "w_qkv": n(ks[2], (D, 3 * D)),
        "b_qkv": n(ks[3], (1, 3 * D)),
        "w_o":   n(ks[4], (D, D)),
        "b_o":   n(ks[5], (1, D)),
        "ln2_g": 1.0 + n(ks[6], (1, D)),
        "ln2_b": n(ks[7], (1, D)),
        "w1":    n(ks[8], (D, M)),
        "b1":    n(ks[9], (1, M)),
        "w2":    n(ks[10], (M, D)),
        "b2":    n(ks[11], (1, D)),
    }


# -----------------------------------------------------------------------------
# Pure-JAX f32 reference (same math as the PyTorch module)
# -----------------------------------------------------------------------------
def reference(x, p, num_heads):
    B, S, D = x.shape
    dh = D // num_heads
    eps = 1e-5

    def ln(v, g, b):
        m = jnp.mean(v, axis=-1, keepdims=True)
        var = jnp.mean((v - m) ** 2, axis=-1, keepdims=True)
        return (v - m) / jnp.sqrt(var + eps) * g + b

    xn = ln(x, p["ln1_g"][0], p["ln1_b"][0])
    qkv = xn @ p["w_qkv"] + p["b_qkv"][0]
    q, k, v = qkv[..., :D], qkv[..., D:2 * D], qkv[..., 2 * D:]

    def split(t):
        return t.reshape(B, S, num_heads, dh).transpose(0, 2, 1, 3)

    qh, kh, vh = split(q), split(k), split(v)
    s = jnp.einsum("bhqd,bhkd->bhqk", qh, kh) / math.sqrt(dh)
    pattn = jax.nn.softmax(s, axis=-1)
    o = jnp.einsum("bhqk,bhkd->bhqd", pattn, vh).transpose(0, 2, 1, 3).reshape(B, S, D)
    o = o @ p["w_o"] + p["b_o"][0]
    x1 = x + o

    xn2 = ln(x1, p["ln2_g"][0], p["ln2_b"][0])
    h1 = xn2 @ p["w1"] + p["b1"][0]
    h1 = 0.5 * h1 * (1.0 + jax.lax.erf(h1 / math.sqrt(2.0)))
    h2 = h1 @ p["w2"] + p["b2"][0]
    return x1 + h2


if __name__ == "__main__":
    B, S, D = 2, 8, 32
    num_heads = 4
    mlp_size = 256

    key = jax.random.PRNGKey(0)
    kx, kp = jax.random.split(key)
    x = jax.random.normal(kx, (B, S, D), dtype=jnp.float32)
    params = init_params(kp, D, mlp_size)
    ref = reference(x, params, num_heads)

    # 1) default plan: weights fully resident, single MLP chunk
    out = jax.block_until_ready(
        transformer_encoder_block(x, params, num_heads=num_heads))
    assert out.shape == (B, S, D)
    assert bool(jnp.all(jnp.isfinite(out)))
    err = float(jnp.max(jnp.abs(out - ref)))
    assert err < 2e-2, f"resident path max abs err {err}"

    # 2) forced streaming + batch-blocking path (exercises the chunk
    #    accumulator, the deeper w1/w2 pipeline and the multi-row attention loop)
    out2 = jax.block_until_ready(
        transformer_encoder_block(x, params, num_heads=num_heads,
                                  mlp_chunk=128, batch_block=2))
    err2 = float(jnp.max(jnp.abs(out2 - ref)))
    assert err2 < 2e-2, f"streaming path max abs err {err2}"

    # 3) unaligned sequence length (S=6 -> padded to 8, key-mask path)
    S3 = 6
    x3 = x[:, :S3, :]
    ref3 = reference(x3, params, num_heads)
    out3 = jax.block_until_ready(
        transformer_encoder_block(x3, params, num_heads=num_heads))
    assert out3.shape == (B, S3, D)
    err3 = float(jnp.max(jnp.abs(out3 - ref3)))
    assert err3 < 2e-2, f"padded path max abs err {err3}"

    print("KERNEL_OK")
</pallas_src>

<mosaic_0001>
module attributes {stable_mosaic.version = 11 : i64} {
  func.func @_encoder_block_kernel(%arg0: i32, %arg1: i32, %arg2: memref<1x8x32xf32, #tpu.memory_space<vmem>>, %arg3: memref<1x32xf32, #tpu.memory_space<vmem>>, %arg4: memref<1x32xf32, #tpu.memory_space<vmem>>, %arg5: memref<32x96xbf16, #tpu.memory_space<vmem>>, %arg6: memref<1x96xf32, #tpu.memory_space<vmem>>, %arg7: memref<32x32xbf16, #tpu.memory_space<vmem>>, %arg8: memref<1x32xf32, #tpu.memory_space<vmem>>, %arg9: memref<1x32xf32, #tpu.memory_space<vmem>>, %arg10: memref<1x32xf32, #tpu.memory_space<vmem>>, %arg11: memref<32x256xbf16, #tpu.memory_space<vmem>>, %arg12: memref<1x256xf32, #tpu.memory_space<vmem>>, %arg13: memref<256x32xbf16, #tpu.memory_space<vmem>>, %arg14: memref<1x32xf32, #tpu.memory_space<vmem>>, %arg15: memref<1x8x32xf32, #tpu.memory_space<vmem>>, %arg16: memref<8x32xf32, #tpu.memory_space<vmem>>, %arg17: memref<8x32xbf16, #tpu.memory_space<vmem>>, %arg18: memref<8x32xf32, #tpu.memory_space<vmem>>, %arg19: memref<8x32xbf16, #tpu.memory_space<vmem>>) attributes {dimension_semantics = [#tpu.dimension_semantics<parallel>, #tpu.dimension_semantics<arbitrary>], iteration_bounds = array<i64: 2, 1>, scalar_prefetch = 0 : i64, scratch_operands = 4 : i64, tpu.core_type = #tpu.core_type<tc>, window_params = [{transform_indices = @transform_0, window_bounds = array<i64: 1, 8, 32>}, {pipeline_mode = #tpu.pipeline_mode<synchronous>, transform_indices = @transform_1, window_bounds = array<i64: 1, 32>}, {pipeline_mode = #tpu.pipeline_mode<synchronous>, transform_indices = @transform_2, window_bounds = array<i64: 1, 32>}, {pipeline_mode = #tpu.pipeline_mode<synchronous>, transform_indices = @transform_3, window_bounds = array<i64: 32, 96>}, {pipeline_mode = #tpu.pipeline_mode<synchronous>, transform_indices = @transform_4, window_bounds = array<i64: 1, 96>}, {pipeline_mode = #tpu.pipeline_mode<synchronous>, transform_indices = @transform_5, window_bounds = array<i64: 32, 32>}, {pipeline_mode = #tpu.pipeline_mode<synchronous>, transform_indices = @transform_6, window_bounds = array<i64: 1, 32>}, {pipeline_mode = #tpu.pipeline_mode<synchronous>, transform_indices = @transform_7, window_bounds = array<i64: 1, 32>}, {pipeline_mode = #tpu.pipeline_mode<synchronous>, transform_indices = @transform_8, window_bounds = array<i64: 1, 32>}, {pipeline_mode = #tpu.pipeline_mode<synchronous>, transform_indices = @transform_9, window_bounds = array<i64: 32, 256>}, {pipeline_mode = #tpu.pipeline_mode<synchronous>, transform_indices = @transform_10, window_bounds = array<i64: 1, 256>}, {pipeline_mode = #tpu.pipeline_mode<synchronous>, transform_indices = @transform_11, window_bounds = array<i64: 256, 32>}, {pipeline_mode = #tpu.pipeline_mode<synchronous>, transform_indices = @transform_12, window_bounds = array<i64: 1, 32>}, {transform_indices = @transform_13, window_bounds = array<i64: 1, 8, 32>}]} {
    %c0_i32 = arith.constant 0 : i32
    %0 = arith.cmpi eq, %arg1, %c0_i32 : i32
    %1 = arith.extui %0 : i1 to i32
    %c0_i32_0 = arith.constant 0 : i32
    %2 = arith.cmpi ne, %1, %c0_i32_0 : i32
    scf.if %2 {
      %c0_18 = arith.constant 0 : index
      %c0_19 = arith.constant 0 : index
      %c0_20 = arith.constant 0 : index
      %31 = vector.load %arg2[%c0_18, %c0_19, %c0_20] : memref<1x8x32xf32, #tpu.memory_space<vmem>>, vector<1x8x32xf32>
      %32 = vector.shape_cast %31 : vector<1x8x32xf32> to vector<8x32xf32>
      %cst_21 = arith.constant dense<0.000000e+00> : vector<8xf32>
      %33 = vector.multi_reduction <add>, %32, %cst_21 [1] : vector<8x32xf32> to vector<8xf32>
      %34 = vector.shape_cast %33 : vector<8xf32> to vector<8x1xf32>
      %cst_22 = arith.constant 3.200000e+01 : f32
      %35 = vector.broadcast %cst_22 : f32 to vector<8x1xf32>
      %36 = arith.divf %34, %35 : vector<8x1xf32>
      %37 = vector.broadcast %36 : vector<8x1xf32> to vector<8x32xf32>
      %38 = arith.subf %32, %37 : vector<8x32xf32>
      %39 = arith.mulf %38, %38 : vector<8x32xf32>
      %cst_23 = arith.constant dense<0.000000e+00> : vector<8xf32>
      %40 = vector.multi_reduction <add>, %39, %cst_23 [1] : vector<8x32xf32> to vector<8xf32>
      %41 = vector.shape_cast %40 : vector<8xf32> to vector<8x1xf32>
      %cst_24 = arith.constant 3.200000e+01 : f32
      %42 = vector.broadcast %cst_24 : f32 to vector<8x1xf32>
      %43 = arith.divf %41, %42 : vector<8x1xf32>
      %cst_25 = arith.constant 9.99999974E-6 : f32
      %44 = vector.broadcast %cst_25 : f32 to vector<8x1xf32>
      %45 = arith.addf %43, %44 : vector<8x1xf32>
      %46 = math.rsqrt %45 : vector<8x1xf32>
      %47 = vector.broadcast %46 : vector<8x1xf32> to vector<8x32xf32>
      %48 = arith.mulf %38, %47 : vector<8x32xf32>
      %c0_26 = arith.constant 0 : index
      %c0_27 = arith.constant 0 : index
      %49 = vector.load %arg3[%c0_26, %c0_27] : memref<1x32xf32, #tpu.memory_space<vmem>>, vector<1x32xf32>
      %50 = vector.shape_cast %49 : vector<1x32xf32> to vector<32xf32>
      %51 = vector.shape_cast %50 : vector<32xf32> to vector<1x32xf32>
      %52 = vector.broadcast %51 : vector<1x32xf32> to vector<8x32xf32>
      %53 = arith.mulf %48, %52 : vector<8x32xf32>
      %c0_28 = arith.constant 0 : index
      %c0_29 = arith.constant 0 : index
      %54 = vector.load %arg4[%c0_28, %c0_29] : memref<1x32xf32, #tpu.memory_space<vmem>>, vector<1x32xf32>
      %55 = vector.shape_cast %54 : vector<1x32xf32> to vector<32xf32>
      %56 = vector.shape_cast %55 : vector<32xf32> to vector<1x32xf32>
      %57 = vector.broadcast %56 : vector<1x32xf32> to vector<8x32xf32>
      %58 = arith.addf %53, %57 : vector<8x32xf32>
      %59 = arith.truncf %58 : vector<8x32xf32> to vector<8x32xbf16>
      %c0_30 = arith.constant 0 : index
      %c0_31 = arith.constant 0 : index
      %60 = vector.load %arg5[%c0_30, %c0_31] : memref<32x96xbf16, #tpu.memory_space<vmem>>, vector<32x96xbf16>
      %cst_32 = arith.constant dense<0.000000e+00> : vector<8x96xf32>
      %61 = tpu.matmul %59, %60, %cst_32 {dimension_numbers = #tpu.dot_dimension_numbers<[1], [0], [0], [1], [0, 0, 1, 1], [], []>} : vector<8x32xbf16>, vector<32x96xbf16>, vector<8x96xf32> -> vector<8x96xf32>
      %c0_33 = arith.constant 0 : index
      %c0_34 = arith.constant 0 : index
      %62 = vector.load %arg6[%c0_33, %c0_34] : memref<1x96xf32, #tpu.memory_space<vmem>>, vector<1x96xf32>
      %63 = vector.shape_cast %62 : vector<1x96xf32> to vector<96xf32>
      %64 = vector.shape_cast %63 : vector<96xf32> to vector<1x96xf32>
      %65 = vector.broadcast %64 : vector<1x96xf32> to vector<8x96xf32>
      %66 = arith.addf %61, %65 : vector<8x96xf32>
      %67 = arith.truncf %66 : vector<8x96xf32> to vector<8x96xbf16>
      %68 = vector.extract_strided_slice %67 {offsets = [0, 0], sizes = [8, 8], strides = [1, 1]} : vector<8x96xbf16> to vector<8x8xbf16>
      %69 = vector.extract_strided_slice %67 {offsets = [0, 32], sizes = [8, 8], strides = [1, 1]} : vector<8x96xbf16> to vector<8x8xbf16>
      %70 = vector.extract_strided_slice %67 {offsets = [0, 64], sizes = [8, 8], strides = [1, 1]} : vector<8x96xbf16> to vector<8x8xbf16>
      %cst_35 = arith.constant dense<0.000000e+00> : vector<8x8xf32>
      %71 = tpu.matmul %68, %69, %cst_35 {dimension_numbers = #tpu.dot_dimension_numbers<[1], [1], [0], [0], [0, 0, 1, 0], [], []>} : vector<8x8xbf16>, vector<8x8xbf16>, vector<8x8xf32> -> vector<8x8xf32>
      %cst_36 = arith.constant dense<0xFF800000> : vector<8xf32>
      %72 = vector.multi_reduction <maximumf>, %71, %cst_36 [1] : vector<8x8xf32> to vector<8xf32>
      %73 = vector.shape_cast %72 : vector<8xf32> to vector<8x1xf32>
      %74 = vector.broadcast %73 : vector<8x1xf32> to vector<8x8xf32>
      %75 = arith.subf %71, %74 : vector<8x8xf32>
      %76 = math.exp %75 : vector<8x8xf32>
      %cst_37 = arith.constant dense<0.000000e+00> : vector<8xf32>
      %77 = vector.multi_reduction <add>, %76, %cst_37 [1] : vector<8x8xf32> to vector<8xf32>
      %78 = vector.shape_cast %77 : vector<8xf32> to vector<8x1xf32>
      %79 = tpu.reciprocal %78 {approx = true} : vector<8x1xf32> -> vector<8x1xf32>
      %80 = vector.broadcast %79 : vector<8x1xf32> to vector<8x8xf32>
      %81 = arith.mulf %76, %80 : vector<8x8xf32>
      %82 = arith.truncf %81 : vector<8x8xf32> to vector<8x8xbf16>
      %cst_38 = arith.constant dense<0.000000e+00> : vector<8x8xf32>
      %83 = tpu.matmul %82, %70, %cst_38 {dimension_numbers = #tpu.dot_dimension_numbers<[1], [0], [0], [1], [0, 0, 1, 1], [], []>} : vector<8x8xbf16>, vector<8x8xbf16>, vector<8x8xf32> -> vector<8x8xf32>
      %84 = arith.truncf %83 : vector<8x8xf32> to vector<8x8xbf16>
      %c0_39 = arith.constant 0 : index
      %c0_40 = arith.constant 0 : index
      %85 = vector.load %arg19[%c0_39, %c0_40] : memref<8x32xbf16, #tpu.memory_space<vmem>>, vector<8x8xbf16>
      tpu.vector_store %arg19[%c0_39, %c0_40], %84 {strides = array<i32>} : memref<8x32xbf16, #tpu.memory_space<vmem>>, vector<8x8xbf16>,
      %86 = vector.extract_strided_slice %67 {offsets = [0, 8], sizes = [8, 8], strides = [1, 1]} : vector<8x96xbf16> to vector<8x8xbf16>
      %87 = vector.extract_strided_slice %67 {offsets = [0, 40], sizes = [8, 8], strides = [1, 1]} : vector<8x96xbf16> to vector<8x8xbf16>
      %88 = vector.extract_strided_slice %67 {offsets = [0, 72], sizes = [8, 8], strides = [1, 1]} : vector<8x96xbf16> to vector<8x8xbf16>
      %cst_41 = arith.constant dense<0.000000e+00> : vector<8x8xf32>
      %89 = tpu.matmul %86, %87, %cst_41 {dimension_numbers = #tpu.dot_dimension_numbers<[1], [1], [0], [0], [0, 0, 1, 0], [], []>} : vector<8x8xbf16>, vector<8x8xbf16>, vector<8x8xf32> -> vector<8x8xf32>
      %cst_42 = arith.constant dense<0xFF800000> : vector<8xf32>
      %90 = vector.multi_reduction <maximumf>, %89, %cst_42 [1] : vector<8x8xf32> to vector<8xf32>
      %91 = vector.shape_cast %90 : vector<8xf32> to vector<8x1xf32>
      %92 = vector.broadcast %91 : vector<8x1xf32> to vector<8x8xf32>
      %93 = arith.subf %89, %92 : vector<8x8xf32>
      %94 = math.exp %93 : vector<8x8xf32>
      %cst_43 = arith.constant dense<0.000000e+00> : vector<8xf32>
      %95 = vector.multi_reduction <add>, %94, %cst_43 [1] : vector<8x8xf32> to vector<8xf32>
      %96 = vector.shape_cast %95 : vector<8xf32> to vector<8x1xf32>
      %97 = tpu.reciprocal %96 {approx = true} : vector<8x1xf32> -> vector<8x1xf32>
      %98 = vector.broadcast %97 : vector<8x1xf32> to vector<8x8xf32>
      %99 = arith.mulf %94, %98 : vector<8x8xf32>
      %100 = arith.truncf %99 : vector<8x8xf32> to vector<8x8xbf16>
      %cst_44 = arith.constant dense<0.000000e+00> : vector<8x8xf32>
      %101 = tpu.matmul %100, %88, %cst_44 {dimension_numbers = #tpu.dot_dimension_numbers<[1], [0], [0], [1], [0, 0, 1, 1], [], []>} : vector<8x8xbf16>, vector<8x8xbf16>, vector<8x8xf32> -> vector<8x8xf32>
      %102 = arith.truncf %101 : vector<8x8xf32> to vector<8x8xbf16>
      %c0_45 = arith.constant 0 : index
      %c8 = arith.constant 8 : index
      %103 = vector.load %arg19[%c0_45, %c8] : memref<8x32xbf16, #tpu.memory_space<vmem>>, vector<8x8xbf16>
      tpu.vector_store %arg19[%c0_45, %c8], %102 {strides = array<i32>} : memref<8x32xbf16, #tpu.memory_space<vmem>>, vector<8x8xbf16>,
      %104 = vector.extract_strided_slice %67 {offsets = [0, 16], sizes = [8, 8], strides = [1, 1]} : vector<8x96xbf16> to vector<8x8xbf16>
      %105 = vector.extract_strided_slice %67 {offsets = [0, 48], sizes = [8, 8], strides = [1, 1]} : vector<8x96xbf16> to vector<8x8xbf16>
      %106 = vector.extract_strided_slice %67 {offsets = [0, 80], sizes = [8, 8], strides = [1, 1]} : vector<8x96xbf16> to vector<8x8xbf16>
      %cst_46 = arith.constant dense<0.000000e+00> : vector<8x8xf32>
      %107 = tpu.matmul %104, %105, %cst_46 {dimension_numbers = #tpu.dot_dimension_numbers<[1], [1], [0], [0], [0, 0, 1, 0], [], []>} : vector<8x8xbf16>, vector<8x8xbf16>, vector<8x8xf32> -> vector<8x8xf32>
      %cst_47 = arith.constant dense<0xFF800000> : vector<8xf32>
      %108 = vector.multi_reduction <maximumf>, %107, %cst_47 [1] : vector<8x8xf32> to vector<8xf32>
      %109 = vector.shape_cast %108 : vector<8xf32> to vector<8x1xf32>
      %110 = vector.broadcast %109 : vector<8x1xf32> to vector<8x8xf32>
      %111 = arith.subf %107, %110 : vector<8x8xf32>
      %112 = math.exp %111 : vector<8x8xf32>
      %cst_48 = arith.constant dense<0.000000e+00> : vector<8xf32>
      %113 = vector.multi_reduction <add>, %112, %cst_48 [1] : vector<8x8xf32> to vector<8xf32>
      %114 = vector.shape_cast %113 : vector<8xf32> to vector<8x1xf32>
      %115 = tpu.reciprocal %114 {approx = true} : vector<8x1xf32> -> vector<8x1xf32>
      %116 = vector.broadcast %115 : vector<8x1xf32> to vector<8x8xf32>
      %117 = arith.mulf %112, %116 : vector<8x8xf32>
      %118 = arith.truncf %117 : vector<8x8xf32> to vector<8x8xbf16>
      %cst_49 = arith.constant dense<0.000000e+00> : vector<8x8xf32>
      %119 = tpu.matmul %118, %106, %cst_49 {dimension_numbers = #tpu.dot_dimension_numbers<[1], [0], [0], [1], [0, 0, 1, 1], [], []>} : vector<8x8xbf16>, vector<8x8xbf16>, vector<8x8xf32> -> vector<8x8xf32>
      %120 = arith.truncf %119 : vector<8x8xf32> to vector<8x8xbf16>
      %c0_50 = arith.constant 0 : index
      %c16 = arith.constant 16 : index
      %121 = vector.load %arg19[%c0_50, %c16] : memref<8x32xbf16, #tpu.memory_space<vmem>>, vector<8x8xbf16>
      tpu.vector_store %arg19[%c0_50, %c16], %120 {strides = array<i32>} : memref<8x32xbf16, #tpu.memory_space<vmem>>, vector<8x8xbf16>,
      %122 = vector.extract_strided_slice %67 {offsets = [0, 24], sizes = [8, 8], strides = [1, 1]} : vector<8x96xbf16> to vector<8x8xbf16>
      %123 = vector.extract_strided_slice %67 {offsets = [0, 56], sizes = [8, 8], strides = [1, 1]} : vector<8x96xbf16> to vector<8x8xbf16>
      %124 = vector.extract_strided_slice %67 {offsets = [0, 88], sizes = [8, 8], strides = [1, 1]} : vector<8x96xbf16> to vector<8x8xbf16>
      %cst_51 = arith.constant dense<0.000000e+00> : vector<8x8xf32>
      %125 = tpu.matmul %122, %123, %cst_51 {dimension_numbers = #tpu.dot_dimension_numbers<[1], [1], [0], [0], [0, 0, 1, 0], [], []>} : vector<8x8xbf16>, vector<8x8xbf16>, vector<8x8xf32> -> vector<8x8xf32>
      %cst_52 = arith.constant dense<0xFF800000> : vector<8xf32>
      %126 = vector.multi_reduction <maximumf>, %125, %cst_52 [1] : vector<8x8xf32> to vector<8xf32>
      %127 = vector.shape_cast %126 : vector<8xf32> to vector<8x1xf32>
      %128 = vector.broadcast %127 : vector<8x1xf32> to vector<8x8xf32>
      %129 = arith.subf %125, %128 : vector<8x8xf32>
      %130 = math.exp %129 : vector<8x8xf32>
      %cst_53 = arith.constant dense<0.000000e+00> : vector<8xf32>
      %131 = vector.multi_reduction <add>, %130, %cst_53 [1] : vector<8x8xf32> to vector<8xf32>
      %132 = vector.shape_cast %131 : vector<8xf32> to vector<8x1xf32>
      %133 = tpu.reciprocal %132 {approx = true} : vector<8x1xf32> -> vector<8x1xf32>
      %134 = vector.broadcast %133 : vector<8x1xf32> to vector<8x8xf32>
      %135 = arith.mulf %130, %134 : vector<8x8xf32>
      %136 = arith.truncf %135 : vector<8x8xf32> to vector<8x8xbf16>
      %cst_54 = arith.constant dense<0.000000e+00> : vector<8x8xf32>
      %137 = tpu.matmul %136, %124, %cst_54 {dimension_numbers = #tpu.dot_dimension_numbers<[1], [0], [0], [1], [0, 0, 1, 1], [], []>} : vector<8x8xbf16>, vector<8x8xbf16>, vector<8x8xf32> -> vector<8x8xf32>
      %138 = arith.truncf %137 : vector<8x8xf32> to vector<8x8xbf16>
      %c0_55 = arith.constant 0 : index
      %c24 = arith.constant 24 : index
      %139 = vector.load %arg19[%c0_55, %c24] : memref<8x32xbf16, #tpu.memory_space<vmem>>, vector<8x8xbf16>
      tpu.vector_store %arg19[%c0_55, %c24], %138 {strides = array<i32>} : memref<8x32xbf16, #tpu.memory_space<vmem>>, vector<8x8xbf16>,
      %c0_56 = arith.constant 0 : index
      %c0_57 = arith.constant 0 : index
      %140 = vector.load %arg19[%c0_56, %c0_57] : memref<8x32xbf16, #tpu.memory_space<vmem>>, vector<8x32xbf16>
      %c0_58 = arith.constant 0 : index
      %c0_59 = arith.constant 0 : index
      %141 = vector.load %arg7[%c0_58, %c0_59] : memref<32x32xbf16, #tpu.memory_space<vmem>>, vector<32x32xbf16>
      %cst_60 = arith.constant dense<0.000000e+00> : vector<8x32xf32>
      %142 = tpu.matmul %140, %141, %cst_60 {dimension_numbers = #tpu.dot_dimension_numbers<[1], [0], [0], [1], [0, 0, 1, 1], [], []>} : vector<8x32xbf16>, vector<32x32xbf16>, vector<8x32xf32> -> vector<8x32xf32>
      %c0_61 = arith.constant 0 : index
      %c0_62 = arith.constant 0 : index
      %143 = vector.load %arg8[%c0_61, %c0_62] : memref<1x32xf32, #tpu.memory_space<vmem>>, vector<1x32xf32>
      %144 = vector.shape_cast %143 : vector<1x32xf32> to vector<32xf32>
      %145 = vector.shape_cast %144 : vector<32xf32> to vector<1x32xf32>
      %146 = vector.broadcast %145 : vector<1x32xf32> to vector<8x32xf32>
      %147 = arith.addf %142, %146 : vector<8x32xf32>
      %148 = arith.addf %32, %147 : vector<8x32xf32>
      %c0_63 = arith.constant 0 : index
      %c0_64 = arith.constant 0 : index
      %149 = vector.load %arg16[%c0_63, %c0_64] : memref<8x32xf32, #tpu.memory_space<vmem>>, vector<8x32xf32>
      tpu.vector_store %arg16[%c0_63, %c0_64], %148 {strides = array<i32>} : memref<8x32xf32, #tpu.memory_space<vmem>>, vector<8x32xf32>,
      %cst_65 = arith.constant dense<0.000000e+00> : vector<8xf32>
      %150 = vector.multi_reduction <add>, %148, %cst_65 [1] : vector<8x32xf32> to vector<8xf32>
      %151 = vector.shape_cast %150 : vector<8xf32> to vector<8x1xf32>
      %cst_66 = arith.constant 3.200000e+01 : f32
      %152 = vector.broadcast %cst_66 : f32 to vector<8x1xf32>
      %153 = arith.divf %151, %152 : vector<8x1xf32>
      %154 = vector.broadcast %153 : vector<8x1xf32> to vector<8x32xf32>
      %155 = arith.subf %148, %154 : vector<8x32xf32>
      %156 = arith.mulf %155, %155 : vector<8x32xf32>
      %cst_67 = arith.constant dense<0.000000e+00> : vector<8xf32>
      %157 = vector.multi_reduction <add>, %156, %cst_67 [1] : vector<8x32xf32> to vector<8xf32>
      %158 = vector.shape_cast %157 : vector<8xf32> to vector<8x1xf32>
      %cst_68 = arith.constant 3.200000e+01 : f32
      %159 = vector.broadcast %cst_68 : f32 to vector<8x1xf32>
      %160 = arith.divf %158, %159 : vector<8x1xf32>
      %cst_69 = arith.constant 9.99999974E-6 : f32
      %161 = vector.broadcast %cst_69 : f32 to vector<8x1xf32>
      %162 = arith.addf %160, %161 : vector<8x1xf32>
      %163 = math.rsqrt %162 : vector<8x1xf32>
      %164 = vector.broadcast %163 : vector<8x1xf32> to vector<8x32xf32>
      %165 = arith.mulf %155, %164 : vector<8x32xf32>
      %c0_70 = arith.constant 0 : index
      %c0_71 = arith.constant 0 : index
      %166 = vector.load %arg9[%c0_70, %c0_71] : memref<1x32xf32, #tpu.memory_space<vmem>>, vector<1x32xf32>
      %167 = vector.shape_cast %166 : vector<1x32xf32> to vector<32xf32>
      %168 = vector.shape_cast %167 : vector<32xf32> to vector<1x32xf32>
      %169 = vector.broadcast %168 : vector<1x32xf32> to vector<8x32xf32>
      %170 = arith.mulf %165, %169 : vector<8x32xf32>
      %c0_72 = arith.constant 0 : index
      %c0_73 = arith.constant 0 : index
      %171 = vector.load %arg10[%c0_72, %c0_73] : memref<1x32xf32, #tpu.memory_space<vmem>>, vector<1x32xf32>
      %172 = vector.shape_cast %171 : vector<1x32xf32> to vector<32xf32>
      %173 = vector.shape_cast %172 : vector<32xf32> to vector<1x32xf32>
      %174 = vector.broadcast %173 : vector<1x32xf32> to vector<8x32xf32>
      %175 = arith.addf %170, %174 : vector<8x32xf32>
      %176 = arith.truncf %175 : vector<8x32xf32> to vector<8x32xbf16>
      %c0_74 = arith.constant 0 : index
      %c0_75 = arith.constant 0 : index
      %177 = vector.load %arg17[%c0_74, %c0_75] : memref<8x32xbf16, #tpu.memory_space<vmem>>, vector<8x32xbf16>
      tpu.vector_store %arg17[%c0_74, %c0_75], %176 {strides = array<i32>} : memref<8x32xbf16, #tpu.memory_space<vmem>>, vector<8x32xbf16>,
    } else {
    }
    %c0 = arith.constant 0 : index
    %c0_1 = arith.constant 0 : index
    %3 = vector.load %arg17[%c0, %c0_1] : memref<8x32xbf16, #tpu.memory_space<vmem>>, vector<8x32xbf16>
    %c0_2 = arith.constant 0 : index
    %c0_3 = arith.constant 0 : index
    %4 = vector.load %arg11[%c0_2, %c0_3] : memref<32x256xbf16, #tpu.memory_space<vmem>>, vector<32x256xbf16>
    %cst = arith.constant dense<0.000000e+00> : vector<8x256xf32>
    %5 = tpu.matmul %3, %4, %cst {dimension_numbers = #tpu.dot_dimension_numbers<[1], [0], [0], [1], [0, 0, 1, 1], [], []>} : vector<8x32xbf16>, vector<32x256xbf16>, vector<8x256xf32> -> vector<8x256xf32>
    %c0_4 = arith.constant 0 : index
    %c0_5 = arith.constant 0 : index
    %6 = vector.load %arg12[%c0_4, %c0_5] : memref<1x256xf32, #tpu.memory_space<vmem>>, vector<1x256xf32>
    %7 = vector.shape_cast %6 : vector<1x256xf32> to vector<256xf32>
    %8 = vector.shape_cast %7 : vector<256xf32> to vector<1x256xf32>
    %9 = vector.broadcast %8 : vector<1x256xf32> to vector<8x256xf32>
    %10 = arith.addf %5, %9 : vector<8x256xf32>
    %cst_6 = arith.constant 5.000000e-01 : f32
    %11 = vector.broadcast %cst_6 : f32 to vector<8x256xf32>
    %12 = arith.mulf %11, %10 : vector<8x256xf32>
    %cst_7 = arith.constant 0.707106769 : f32
    %13 = vector.broadcast %cst_7 : f32 to vector<8x256xf32>
    %14 = arith.mulf %10, %13 : vector<8x256xf32>
    %15 = math.erf %14 : vector<8x256xf32>
    %cst_8 = arith.constant 1.000000e+00 : f32
    %16 = vector.broadcast %cst_8 : f32 to vector<8x256xf32>
    %17 = arith.addf %16, %15 : vector<8x256xf32>
    %18 = arith.mulf %12, %17 : vector<8x256xf32>
    %19 = arith.truncf %18 : vector<8x256xf32> to vector<8x256xbf16>
    %c0_9 = arith.constant 0 : index
    %c0_10 = arith.constant 0 : index
    %20 = vector.load %arg13[%c0_9, %c0_10] : memref<256x32xbf16, #tpu.memory_space<vmem>>, vector<256x32xbf16>
    %cst_11 = arith.constant dense<0.000000e+00> : vector<8x32xf32>
    %21 = tpu.matmul %19, %20, %cst_11 {dimension_numbers = #tpu.dot_dimension_numbers<[1], [0], [0], [1], [0, 0, 1, 1], [], []>} : vector<8x256xbf16>, vector<256x32xbf16>, vector<8x32xf32> -> vector<8x32xf32>
    %c0_i32_12 = arith.constant 0 : i32
    %22 = arith.cmpi eq, %arg1, %c0_i32_12 : i32
    %23 = arith.extui %22 : i1 to i32
    %c0_i32_13 = arith.constant 0 : i32
    %24 = arith.cmpi ne, %23, %c0_i32_13 : i32
    scf.if %24 {
      %c0_18 = arith.constant 0 : index
      %c0_19 = arith.constant 0 : index
      %31 = vector.load %arg18[%c0_18, %c0_19] : memref<8x32xf32, #tpu.memory_space<vmem>>, vector<8x32xf32>
      tpu.vector_store %arg18[%c0_18, %c0_19], %21 {strides = array<i32>} : memref<8x32xf32, #tpu.memory_space<vmem>>, vector<8x32xf32>,
    } else {
    }
    %c0_i32_14 = arith.constant 0 : i32
    %25 = arith.cmpi sgt, %arg1, %c0_i32_14 : i32
    %26 = arith.extui %25 : i1 to i32
    %c0_i32_15 = arith.constant 0 : i32
    %27 = arith.cmpi ne, %26, %c0_i32_15 : i32
    scf.if %27 {
      %c0_18 = arith.constant 0 : index
      %c0_19 = arith.constant 0 : index
      %31 = vector.load %arg18[%c0_18, %c0_19] : memref<8x32xf32, #tpu.memory_space<vmem>>, vector<8x32xf32>
      %32 = arith.addf %31, %21 : vector<8x32xf32>
      %c0_20 = arith.constant 0 : index
      %c0_21 = arith.constant 0 : index
      %33 = vector.load %arg18[%c0_20, %c0_21] : memref<8x32xf32, #tpu.memory_space<vmem>>, vector<8x32xf32>
      tpu.vector_store %arg18[%c0_20, %c0_21], %32 {strides = array<i32>} : memref<8x32xf32, #tpu.memory_space<vmem>>, vector<8x32xf32>,
    } else {
    }
    %c0_i32_16 = arith.constant 0 : i32
    %28 = arith.cmpi eq, %arg1, %c0_i32_16 : i32
    %29 = arith.extui %28 : i1 to i32
    %c0_i32_17 = arith.constant 0 : i32
    %30 = arith.cmpi ne, %29, %c0_i32_17 : i32
    scf.if %30 {
      %c0_18 = arith.constant 0 : index
      %c0_19 = arith.constant 0 : index
      %31 = vector.load %arg16[%c0_18, %c0_19] : memref<8x32xf32, #tpu.memory_space<vmem>>, vector<8x32xf32>
      %c0_20 = arith.constant 0 : index
      %c0_21 = arith.constant 0 : index
      %32 = vector.load %arg18[%c0_20, %c0_21] : memref<8x32xf32, #tpu.memory_space<vmem>>, vector<8x32xf32>
      %33 = arith.addf %31, %32 : vector<8x32xf32>
      %c0_22 = arith.constant 0 : index
      %c0_23 = arith.constant 0 : index
      %34 = vector.load %arg14[%c0_22, %c0_23] : memref<1x32xf32, #tpu.memory_space<vmem>>, vector<1x32xf32>
      %35 = vector.shape_cast %34 : vector<1x32xf32> to vector<32xf32>
      %36 = vector.shape_cast %35 : vector<32xf32> to vector<1x32xf32>
      %37 = vector.broadcast %36 : vector<1x32xf32> to vector<8x32xf32>
      %38 = arith.addf %33, %37 : vector<8x32xf32>
      %c0_24 = arith.constant 0 : index
      %c0_25 = arith.constant 0 : index
      %c0_26 = arith.constant 0 : index
      %39 = vector.load %arg15[%c0_24, %c0_25, %c0_26] : memref<1x8x32xf32, #tpu.memory_space<vmem>>, vector<1x8x32xf32>
      %40 = vector.shape_cast %39 : vector<1x8x32xf32> to vector<8x32xf32>
      %41 = vector.shape_cast %38 : vector<8x32xf32> to vector<1x8x32xf32>
      tpu.vector_store %arg15[%c0_24, %c0_25, %c0_26], %41 {strides = array<i32>} : memref<1x8x32xf32, #tpu.memory_space<vmem>>, vector<1x8x32xf32>,
    } else {
    }
    return
  }
  func.func @transform_0(%arg0: i32, %arg1: i32) -> (i32, i32, i32) {
    %c0_i32 = arith.constant 0 : i32
    %c0_i32_0 = arith.constant 0 : i32
    %c0_i32_1 = arith.constant 0 : i32
    return %arg0, %c0_i32, %c0_i32_0 : i32, i32, i32
  }
  func.func @transform_1(%arg0: i32, %arg1: i32) -> (i32, i32) {
    %c0_i32 = arith.constant 0 : i32
    %c0_i32_0 = arith.constant 0 : i32
    %c0_i32_1 = arith.constant 0 : i32
    return %c0_i32, %c0_i32_0 : i32, i32
  }
  func.func @transform_2(%arg0: i32, %arg1: i32) -> (i32, i32) {
    %c0_i32 = arith.constant 0 : i32
    %c0_i32_0 = arith.constant 0 : i32
    %c0_i32_1 = arith.constant 0 : i32
    return %c0_i32, %c0_i32_0 : i32, i32
  }
  func.func @transform_3(%arg0: i32, %arg1: i32) -> (i32, i32) {
    %c0_i32 = arith.constant 0 : i32
    %c0_i32_0 = arith.constant 0 : i32
    %c0_i32_1 = arith.constant 0 : i32
    return %c0_i32, %c0_i32_0 : i32, i32
  }
  func.func @transform_4(%arg0: i32, %arg1: i32) -> (i32, i32) {
    %c0_i32 = arith.constant 0 : i32
    %c0_i32_0 = arith.constant 0 : i32
    %c0_i32_1 = arith.constant 0 : i32
    return %c0_i32, %c0_i32_0 : i32, i32
  }
  func.func @transform_5(%arg0: i32, %arg1: i32) -> (i32, i32) {
    %c0_i32 = arith.constant 0 : i32
    %c0_i32_0 = arith.constant 0 : i32
    %c0_i32_1 = arith.constant 0 : i32
    return %c0_i32, %c0_i32_0 : i32, i32
  }
  func.func @transform_6(%arg0: i32, %arg1: i32) -> (i32, i32) {
    %c0_i32 = arith.constant 0 : i32
    %c0_i32_0 = arith.constant 0 : i32
    %c0_i32_1 = arith.constant 0 : i32
    return %c0_i32, %c0_i32_0 : i32, i32
  }
  func.func @transform_7(%arg0: i32, %arg1: i32) -> (i32, i32) {
    %c0_i32 = arith.constant 0 : i32
    %c0_i32_0 = arith.constant 0 : i32
    %c0_i32_1 = arith.constant 0 : i32
    return %c0_i32, %c0_i32_0 : i32, i32
  }
  func.func @transform_8(%arg0: i32, %arg1: i32) -> (i32, i32) {
    %c0_i32 = arith.constant 0 : i32
    %c0_i32_0 = arith.constant 0 : i32
    %c0_i32_1 = arith.constant 0 : i32
    return %c0_i32, %c0_i32_0 : i32, i32
  }
  func.func @transform_9(%arg0: i32, %arg1: i32) -> (i32, i32) {
    %c0_i32 = arith.constant 0 : i32
    %c0_i32_0 = arith.constant 0 : i32
    return %c0_i32, %arg1 : i32, i32
  }
  func.func @transform_10(%arg0: i32, %arg1: i32) -> (i32, i32) {
    %c0_i32 = arith.constant 0 : i32
    %c0_i32_0 = arith.constant 0 : i32
    return %c0_i32, %arg1 : i32, i32
  }
  func.func @transform_11(%arg0: i32, %arg1: i32) -> (i32, i32) {
    %c0_i32 = arith.constant 0 : i32
    %c0_i32_0 = arith.constant 0 : i32
    return %arg1, %c0_i32 : i32, i32
  }
  func.func @transform_12(%arg0: i32, %arg1: i32) -> (i32, i32) {
    %c0_i32 = arith.constant 0 : i32
    %c0_i32_0 = arith.constant 0 : i32
    %c0_i32_1 = arith.constant 0 : i32
    return %c0_i32, %c0_i32_0 : i32, i32
  }
  func.func @transform_13(%arg0: i32, %arg1: i32) -> (i32, i32, i32) {
    %c0_i32 = arith.constant 0 : i32
    %c0_i32_0 = arith.constant 0 : i32
    %c0_i32_1 = arith.constant 0 : i32
    return %arg0, %c0_i32, %c0_i32_0 : i32, i32, i32
  }
}

</mosaic_0001>

<bundles_post_ra>
// kernel: tpu_custom_call.1
= control target key start
LH: loop header
LB: loop body
LE: loop exit
PB: predicated region body
PF: predicated region fallthrough
CT: control target
= control target key end

     0   :  { %s2337_s0 = inlined_call_operand.vmem [shape: f32[2,8,32], index: 0, kind: input, shape index: {}]   ;;  %s2338_s1 = inlined_call_operand.vmem [shape: f32[1,32], index: 1, kind: input, shape index: {}]   ;;  %s2339_s2 = inlined_call_operand.vmem [shape: f32[1,32], index: 2, kind: input, shape index: {}]   ;;  %s2340_s3 = inlined_call_operand.vmem [shape: bf16[32,96], index: 3, kind: input, shape index: {}]   ;;  %s2341_s4 = inlined_call_operand.vmem [shape: f32[1,96], index: 4, kind: input, shape index: {}]   ;;  %s2342_s5 = inlined_call_operand.vmem [shape: bf16[32,32], index: 5, kind: input, shape index: {}]   ;;  %s2343_s6 = inlined_call_operand.vmem [shape: f32[1,32], index: 6, kind: input, shape index: {}]   ;;  %s2344_s7 = inlined_call_operand.vmem [shape: f32[1,32], index: 7, kind: input, shape index: {}]   ;;  %s2345_s8 = inlined_call_operand.vmem [shape: f32[1,32], index: 8, kind: input, shape index: {}]   ;;  %s2346_s9 = inlined_call_operand.vmem [shape: bf16[32,256], index: 9, kind: input, shape index: {}]   ;;  %s2347_s10 = inlined_call_operand.vmem [shape: f32[1,256], index: 10, kind: input, shape index: {}]   ;;  %s2348_s11 = inlined_call_operand.vmem [shape: bf16[256,32], index: 11, kind: input, shape index: {}]   ;;  %s2349_s12 = inlined_call_operand.vmem [shape: f32[1,32], index: 12, kind: input, shape index: {}]   ;;  %s2350_s13 = inlined_call_operand.hbm [shape: f32[2,8,32], index: 13, kind: output, shape index: {}]  }
   0x1   :  { %2351 = sst [smem:[#allocation9_spill]] %s2337_s0 }
   0x2   :  { %2352 = sst [smem:[#allocation10_spill]] %s2338_s1 }
   0x3   :  { %2353 = sst [smem:[#allocation11_spill]] %s2339_s2 }
   0x4   :  { %2354 = sst [smem:[#allocation12_spill]] %s2340_s3 }
   0x5   :  { %2355 = sst [smem:[#allocation13_spill]] %s2341_s4 }
   0x6   :  { %18 = vsyncpa [#allocation7], 0 }
   0x7   :  { %20 = vsyncpa [#allocation7 + $0x1], 0  ;;  %s2057_s25 = smov 0   ;;  %s2059_s26 = smov 0  }
   0x8   :  { %s2061_s27 = smov 0   ;;  %s2063_s28 = smov 0  }
   0x9   :  { %s2065_s29 = smov 0   ;;  %s2067_s30 = smov 0  }
   0xa LB: > { %s1599_s14 = sadd.s32 4294967295, %s1967_s30   ;;  %s1600_s15 = sadd.s32 4294967294, %s1967_s30   ;;  %s1967_s30 = sphi %s2067_s30, %s26_s30   ;;  %s1963_s29 = sphi %s2065_s29, %s2367_s29   ;;  %s1959_s28 = sphi %s2063_s28, %s2366_s28   ;;  %s1955_s27 = sphi %s2061_s27, %s2365_s27   ;;  %s1951_s26 = sphi %s2059_s26, %s2364_s26   ;;  %s1947_s25 = sphi %s2057_s25, %s2363_s25  }
   0xb   : > { %s38_s16 = sadd.s32 1, %s1963_s29  ;;  %s338_s17 = sadd.s32 1, %s1955_s27 }
   0xc   : > { %p40_p0 = scmp.ge.s32.totalorder %s38_s16, 2  ;;  %p348_p1 = scmp.ne.s32.totalorder %s1955_s27, %s1951_s26 }
   0xd   : > { %p349_p2 = scmp.eq.s32.totalorder %s1599_s14, 1  ;;  %p354_p3 = scmp.ne.s32.totalorder %s1951_s26, %s1947_s25 }
   0xe   : > { %s2369_s16 = smov (%p40_p0, %s38_s16), 0  ;;  %p355_p5 = scmp.eq.s32.totalorder %s1600_s15, 1 }
   0xf   : > { %p2097_p4 = por %p349_p2, %p348_p1  ;;  %s335_s19 = ssub.s32 %s1963_s29, %s2369_s16 }
  0x10   : > { %p1606_p6 = scmp.ge.s32.totalorder %s1967_s30, 1  ;;  %p336_p7 = scmp.eq.s32.totalorder %s335_s19, 0 }
  0x11   : > { %p2104_p8 = por %p355_p5, %p354_p3  ;;  %p433_p9 = scmp.lt.s32.totalorder %s1967_s30, 3 }
  0x12   : > { %s2110_s21 = scalar_select %p336_p7, %s1955_s27, %s338_s17  }
  0x13   : > { %p434_p10 = pnand %p1606_p6, %p433_p9 }
  0x14   : > { %p490_p11 = scmp.lt.s32.totalorder (!%p434_p10), %s1959_s28, 1  ;;  %s2358_s0 = sld [smem:[#allocation9_spill]] (!%p434_p10) }
  0x15   : > { %437 = sbr.rel (%p434_p10) target bundleno = 2504 (0x9c8), region = 72  ;;  %s2359_s3 = sld [smem:[#allocation12_spill]] (!%p434_p10) }
  0x16   : > { %s2360_s1 = sld [smem:[#allocation10_spill]] (!%p434_p10)  ;;  %s1972_s24 = smov (!%p434_p10), 96  }
  0x17   : > { %s2361_s2 = sld [smem:[#allocation11_spill]] (!%p434_p10)  ;;  %s1973_s14 = smov (!%p434_p10), 88  }
  0x18   : > { %s2362_s4 = sld [smem:[#allocation13_spill]] (!%p434_p10)  ;;  %s1975_s17 = smov (!%p434_p10), 112  }
  0x19   : > { %s1976_s19 = smov (!%p434_p10), 72  }
  0x1a   : > { %s491_s22 = scalar_select %p490_p11, %s1959_s28, 1  ;;  %vm517_vm0 = vcmask 261120   ;;  %v1969_v8 = vmov 0.0   ;;  %vm1970_vm1 = vmmov 0   ;;  %vm619_vm2 = vcmask 64512  }
  0x1b   : > { %v1841_v7 = vld [vmem:[%s2359_s3 + $0x8] sm:$0xff]   ;;  %1705 = vmatprep.subr.bf16.mxu0 %v1969_v8  ;;  %1709 = vmatprep.mubr.msk.bf16.mxu0 %vm1970_vm1, %v1969_v8  ;;  %v1842_v9 = vld [vmem:[%s2359_s3] sm:$0xff]   ;;  %vm683_vm3 = vcmask 1043456   ;;  %vm728_vm4 = vcmask 60416   ;;  %vm847_vm5 = vcmask 126016   ;;  %vm966_vm6 = vcmask 191616  }
  0x1c   : > { %s1608_s23 = sshll.u32 %s491_s22, 3  ;;  %1706 = vmatpush3.bf16.msra.mxu0 %v1841_v7  ;;  %1725 = vmatprep.subr.bf16.mxu1 %v1969_v8  ;;  %v1609_v14 = vld [vmem:[%s2360_s1] ss:$0 sm:$0xff]  ;;  %s1977_s22 = smov 104   ;;  %vm1085_vm7 = vcmask 257216   ;;  %vm1186_vm8 = vcmask 257024  }
  0x1d   : > { %s493_s15 = scalar_lea.vmem %s2358_s0, %s1608_s23  ;;  %1707 = vmatprep.subr.bf16.mxu0 %v1969_v8  ;;  %1727 = vmatprep.mubr.msk.bf16.mxu1 %vm1970_vm1, %v1969_v8  ;;  %v1610_v16 = vld [vmem:[%s2361_s2] ss:$0 sm:$0xff]  ;;  %s1971_s23 = smov 120  }
  0x1e   : > { %v2117_v0 = vld [vmem:[%s493_s15] sm:$0xff]  ;;  %s1974_s15 = smov 80   ;;  %s1655_s0 = sshll.u32 %s1959_s28, 7 }
  0x1f   : > { %v518_v1 = vsel %vm517_vm0, %v2117_v0, 0.0  ;;  %v1611_v20 = vld [vmem:[%s2362_s4] ss:$0 sm:$0xff]  ;;  %s1488_s2 = scalar_lea.hbm %s2350_s13, %s1655_s0 }
  0x20   : > { %519 = vadd.xlane.f32.xlu0 %v518_v1  ;;  %1708 = vmatpush3.bf16.msra.mxu0 %v1842_v9 }
  0x21   : > { %1713 = vmatprep.subr.bf16.mxu0 %v1969_v8 }
  0xa9   : > { %v520_v2 = vpop.xlane.xlu0 %519 }
  0xaa   : > { %v522_v3 = vmul.f32 0.03125, %v520_v2 }
  0xac   : > { %v523_v4 = vsub.f32 %v2117_v0, %v522_v3 }
  0xae   : > { %v524_v5 = vmul.f32 %v523_v4, %v523_v4 }
  0xb0   : > { %v525_v6 = vsel %vm517_vm0, %v524_v5, 0.0 }
  0xb1   : > { %526 = vadd.xlane.f32.xlu0 %v525_v6 }
 0x13a   : > { %v527_v10 = vpop.xlane.xlu0 %526 }
 0x13b   : > { %v528_v11 = vmul.f32 0.03125, %v527_v10 }
 0x13d   : > { %v529_v12 = vadd.f32 1e-05, %v528_v11 }
 0x13f   : > { %1867 = vrsqrt.f32 %v529_v12 }
 0x14c   : > { %v1868_v13 = vpop.eup %1867 }
 0x14d   : > { %v531_v15 = vmul.f32 %v1868_v13, %v523_v4 }
 0x14f   : > { %v539_v17 = vmul.f32 %v1609_v14, %v531_v15 }
 0x151   : > { %v547_v18 = vadd.f32 %v1610_v16, %v539_v17 }
 0x153   : > { %v548_v19 = vpack.c.bf16 %v547_v18, %v547_v18 }
 0x155   : > { %1710 = vmatmul.mubr.msk.bf16.vlgmr.msra.gmra.mxu0 %vm517_vm0, %v548_v19 }
 0x156   : > { %1715 = vmatprep.mubr.msk.bf16.mxu0 %vm1970_vm1, %v1969_v8 }
 0x215   : > { %v609_v21 = vpop.f32.mrf.mxu0 }
 0x216   : > { %v610_v22 = vadd.f32 %v1611_v20, %v609_v21 }
 0x217   : > { %v1711_v23 = vpop.f32.mrf.mxu0 }
 0x218   : > { %v2149_v24 = vpack.c.bf16 %v610_v22, %v610_v22 }
 0x219   : > { %v612_v25 = vpop.f32.mrf.mxu0 }
 0x21a   : > { %730 = vrot.lane.b32.xlu0 %v2149_v24, %s1971_s23  ;;  %617 = vrot.lane.b32.xlu1 %v2149_v24, %s1972_s24  ;;  %s1978_s23 = smov 64   ;;  %s1979_s24 = smov 56  }
 0x21b   : > { %v1712_v26 = vpop.f32.mrf.mxu0 }
 0x21e   : > { %732 = vrot.lane.b32.xlu1 %v2149_v24, %s1973_s14  ;;  %s1980_s14 = smov 48  }
 0x222   : > { %851 = vrot.lane.b32.xlu1 %v2149_v24, %s1974_s15  ;;  %s1981_s15 = smov 40  }
 0x226   : > { %849 = vrot.lane.b32.xlu1 %v2149_v24, %s1975_s17  ;;  %s1982_s17 = smov 8  }
 0x22a   : > { %970 = vrot.lane.b32.xlu1 %v2149_v24, %s1976_s19 }
 0x22e   : > { %968 = vrot.lane.b32.xlu1 %v2149_v24, %s1977_s22  ;;  %s487_s22 = sand.u32 1, %s1951_s26  }
 0x22f   : > { %s1477_s3 = scalar_lea.sflag [#allocation7], %s487_s22 }
 0x28c   : > { %v618_v27 = vpop.permute.xlu1 %617  ;;  %v731_v32 = vpop.permute.xlu0 %730 }
 0x28d   : > { %v624_v28 = vsel %vm619_vm2, %v618_v27, 0 }
 0x28e   : > { %1714 = vmatpush3.bf16.xpose.msra.mxu0 %v624_v28 }
 0x28f   : > { %1719 = vmatprep.subr.bf16.mxu0 %v1969_v8 }
 0x290   : > { %v733_v29 = vpop.permute.xlu1 %732 }
 0x291   : > { %v738_v30 = vsel %vm619_vm2, %v733_v29, 0 }
 0x292   : > { %1726 = vmatpush3.bf16.xpose.msra.mxu1 %v738_v30 }
 0x293   : > { %1737 = vmatprep.subr.bf16.mxu1 %v1969_v8 }
 0x294   : > { %v852_v31 = vpop.permute.xlu1 %851 }
 0x295   : > { %1716 = vmatmul.mubr.msk.bf16.vlgmr.msra.gmra.mxu0 %vm619_vm2, %v2149_v24  ;;  %v857_v34 = vsel %vm619_vm2, %v852_v31, 0 }
 0x296   : > { %1721 = vmatprep.mubr.msk.bf16.mxu0 %vm1970_vm1, %v1969_v8 }
 0x298   : > { %v850_v33 = vpop.permute.xlu1 %849 }
 0x299   : > { %1728 = vmatmul.mubr.msk.bf16.vlgmr.msra.gmra.mxu1 %vm619_vm2, %v731_v32 }
 0x29a   : > { %1738 = vmatpush3.bf16.xpose.msra.mxu1 %v857_v34  ;;  %1739 = vmatprep.mubr.msk.bf16.mxu1 %vm1970_vm1, %v1969_v8 }
 0x29b   : > { %1749 = vmatprep.subr.bf16.mxu1 %v1969_v8 }
 0x29c   : > { %v971_v35 = vpop.permute.xlu1 %970 }
 0x29d   : > { %v976_v36 = vsel %vm619_vm2, %v971_v35, 0 }
 0x2a0   : > { %v969_v37 = vpop.permute.xlu1 %968 }
 0x2a1   : > { %1740 = vmatmul.mubr.msk.bf16.vlgmr.msra.gmra.mxu1 %vm619_vm2, %v850_v33 }
 0x2a2   : > { %1750 = vmatpush3.bf16.xpose.msra.mxu1 %v976_v36  ;;  %1751 = vmatprep.mubr.msk.bf16.mxu1 %vm1970_vm1, %v1969_v8 }
 0x2a3   : > { %1761 = vmatprep.subr.bf16.mxu1 %v1969_v8 }
 0x2a9   : > { %1752 = vmatmul.mubr.msk.bf16.vlgmr.msra.gmra.mxu1 %vm619_vm2, %v969_v37 }
 0x2aa   : > { %1765 = vmatprep.mubr.msk.bf16.mxu1 %vm1970_vm1, %v1969_v8 }
 0x355   : > { %v660_v38 = vpop.f32.mrf.mxu0 }
 0x356   : > { %v666_v39 = vsel %vm619_vm2, %v660_v38, -inf }
 0x357   : > { %667 = vmax.xlane.f32.xlu1 %v666_v39  ;;  %v1717_v40 = vpop.f32.mrf.mxu0 }
 0x359   : > { %v663_v41 = vpop.f32.mrf.mxu0  ;;  %v774_v42 = vpop.f32.mrf.mxu1 }
 0x35a   : > { %v780_v43 = vsel %vm619_vm2, %v774_v42, -inf }
 0x35b   : > { %781 = vmax.xlane.f32.xlu0 %v780_v43  ;;  %v1718_v44 = vpop.f32.mrf.mxu0  ;;  %v1729_v45 = vpop.f32.mrf.mxu1 }
 0x35d   : > { %v777_v46 = vpop.f32.mrf.mxu1 }
 0x35f   : > { %v1730_v47 = vpop.f32.mrf.mxu1 }
 0x361   : > { %v893_v48 = vpop.f32.mrf.mxu1 }
 0x362   : > { %v899_v49 = vsel %vm619_vm2, %v893_v48, -inf }
 0x363   : > { %v1741_v50 = vpop.f32.mrf.mxu1  ;;  %900 = vmax.xlane.f32.xlu1 %v899_v49 }
 0x364   : > { %v1843_v50 = vld [vmem:[%s2342_s5 + $0x8] sm:$0xff]  }
 0x365   : > { %v896_v51 = vpop.f32.mrf.mxu1  ;;  %1762 = vmatpush3.bf16.msra.mxu1 %v1843_v50  ;;  %v1193_v50 = vld [vmem:[%s2347_s10] sm:$0x3] }
 0x366   : > { %1763 = vmatprep.subr.bf16.mxu1 %v1969_v8 }
 0x367   : > { %v1742_v52 = vpop.f32.mrf.mxu1 }
 0x368   : > { %v1844_v52 = vld [vmem:[%s2342_s5] sm:$0xff]  }
 0x369   : > { %v1012_v53 = vpop.f32.mrf.mxu1  ;;  %1764 = vmatpush3.bf16.msra.mxu1 %v1844_v52 }
 0x36a   : > { %v1018_v54 = vsel %vm619_vm2, %v1012_v53, -inf }
 0x36b   : > { %1019 = vmax.xlane.f32.xlu0 %v1018_v54  ;;  %v1753_v55 = vpop.f32.mrf.mxu1 }
 0x36d   : > { %v1015_v56 = vpop.f32.mrf.mxu1 }
 0x36f   : > { %v1754_v57 = vpop.f32.mrf.mxu1 }
 0x3e0   : > { %v668_v58 = vpop.xlane.xlu1 %667 }
 0x3e1   : > { %v669_v59 = vsub.f32 %v660_v38, %v668_v58 }
 0x3e3   : > { %v670_v60 = vmul.f32 1.442695, %v669_v59 }
 0x3e4   : > { %v782_v61 = vpop.xlane.xlu0 %781 }
 0x3e5   : > { %1869 = vpow2.f32 %v670_v60  ;;  %v783_v62 = vsub.f32 %v774_v42, %v782_v61 }
 0x3e7   : > { %v784_v63 = vmul.f32 1.442695, %v783_v62 }
 0x3e9   : > { %1871 = vpow2.f32 %v784_v63 }
 0x3ec   : > { %v901_v11 = vpop.xlane.xlu1 %900 }
 0x3ed   : > { %v902_v12 = vsub.f32 %v893_v48, %v901_v11 }
 0x3ef   : > { %v903_v13 = vmul.f32 1.442695, %v902_v12 }
 0x3f2   : > { %v1870_v1 = vpop.eup %1869 }
 0x3f3   : > { %v672_v2 = vsel %vm619_vm2, %v1870_v1, 0.0 }
 0x3f4   : > { %v1020_v3 = vpop.xlane.xlu0 %1019  ;;  %673 = vadd.xlane.f32.xlu1 %v672_v2  ;;  %v1626_v2 = vld [vmem:[%s2343_s6] ss:$0 sm:$0xff] }
 0x3f5   : > { %v1021_v4 = vsub.f32 %v1012_v53, %v1020_v3 }
 0x3f6   : > { %v1872_v5 = vpop.eup %1871 }
 0x3f7   : > { %v1022_v6 = vmul.f32 1.442695, %v1021_v4  ;;  %v786_v7 = vsel %vm619_vm2, %v1872_v5, 0.0 }
 0x3f8   : > { %787 = vadd.xlane.f32.xlu0 %v786_v7 }
 0x3f9   : > { %1873 = vpow2.f32 %v1022_v6 }
 0x3fa   : > { %1875 = vpow2.f32 %v903_v13 }
 0x405   : > { %678 = vrot.lane.b32.xlu1 %v2149_v24, %s1978_s23  ;;  %s1607_s23 = sshll.u32 %s487_s22, 3 }
 0x406   : > { %v1874_v9 = vpop.eup %1873 }
 0x407   : > { %v1024_v10 = vsel %vm619_vm2, %v1874_v9, 0.0  ;;  %v1876_v14 = vpop.eup %1875 }
 0x408   : > { %1025 = vadd.xlane.f32.xlu0 %v1024_v10  ;;  %v905_v15 = vsel %vm619_vm2, %v1876_v14, 0.0 }
 0x41e   : > { %792 = vrot.lane.b32.xlu0 %v2149_v24, %s1979_s24  ;;  %s1986_s24 = smov [#allocation6]  }
 0x429   : > { %906 = vadd.xlane.f32.xlu1 %v905_v15 }
 0x43a   : > { %911 = vrot.lane.b32.xlu1 %v2149_v24, %s1980_s14  ;;  %s1983_s14 = smov 16  }
 0x43e   : > { %1030 = vrot.lane.b32.xlu1 %v2149_v24, %s1981_s15  ;;  %s1984_s15 = smov 24  }
 0x47d   : > { %v674_v16 = vpop.xlane.xlu1 %673 }
 0x47e   : > { %1877 = vrcp.f32 %v674_v16  ;;  %v1847_v16 = vld [vmem:[%s2346_s9 + $0x14] ss:$8 sps:$4 sm:$0xff]  }
 0x481   : > { %v788_v17 = vpop.xlane.xlu0 %787  ;;  %v679_v18 = vpop.permute.xlu1 %678 }
 0x482   : > { %v685_v19 = vsel %vm683_vm3, %v679_v18, 0  ;;  %1879 = vrcp.f32 %v788_v17  ;;  %v1850_v17 = vld [vmem:[%s2346_s9 + $0x4] ss:$8 sps:$4 sm:$0xff]   ;;  %v1848_v18 = vld [vmem:[%s2346_s9] ss:$8 sps:$4 sm:$0xff]  }
 0x483   : > { %1720 = vmatpush3.bf16.msra.mxu0 %v685_v19  ;;  %v1985_v19 = vmov 0  }
 0x484   : > { %1731 = vmatprep.subr.bf16.mxu0 %v1969_v8 }
 0x48b   : > { %v1878_v20 = vpop.eup %1877 }
 0x48c   : > { %v676_v21 = vmul.f32 %v1878_v20, %v1870_v1  ;;  %v1851_v20 = vld [vmem:[%s2348_s11 + $0x78] sm:$0xff]  }
 0x48d   : > { %1683 = vmatprep.subr.bf16.mxu1 %v1851_v20 }
 0x48e   : > { %v677_v22 = vpack.c.bf16 %v676_v21, %v676_v21  ;;  %v1852_v21 = vld [vmem:[%s2348_s11 + $0x38] sm:$0xff]  }
 0x48f   : > { %v1880_v23 = vpop.eup %1879 }
 0x490   : > { %1722 = vmatmul.mubr.msk.bf16.vlgmr.msra.gmra.mxu0 %vm619_vm2, %v677_v22  ;;  %v790_v24 = vmul.f32 %v1880_v23, %v1872_v5 }
 0x491   : > { %v1026_v25 = vpop.xlane.xlu0 %1025  ;;  %1733 = vmatprep.mubr.msk.bf16.mxu0 %vm1970_vm1, %v1969_v8 }
 0x492   : > { %v791_v28 = vpack.c.bf16 %v790_v24, %v790_v24 }
 0x495   : > { %v793_v26 = vpop.permute.xlu0 %792 }
 0x496   : > { %v798_v27 = vsel %vm683_vm3, %v793_v26, 0  ;;  %v1630_v26 = vld [vmem:[%s2344_s7] ss:$0 sm:$0xff] }
 0x497   : > { %1732 = vmatpush3.bf16.msra.mxu0 %v798_v27 }
 0x498   : > { %1743 = vmatprep.subr.bf16.mxu0 %v1969_v8 }
 0x49a   : > { %1734 = vmatmul.mubr.msk.bf16.vlgmr.msra.gmra.mxu0 %vm619_vm2, %v791_v28  ;;  %v1631_v28 = vld [vmem:[%s2345_s8] ss:$0 sm:$0xff] }
 0x49b   : > { %1745 = vmatprep.mubr.msk.bf16.mxu0 %vm1970_vm1, %v1969_v8 }
 0x4b2   : > { %v907_v29 = vpop.xlane.xlu1 %906 }
 0x4b3   : > { %1881 = vrcp.f32 %v907_v29 }
 0x4b4   : > { %1883 = vrcp.f32 %v1026_v25 }
 0x4b6   : > { %v912_v30 = vpop.permute.xlu1 %911 }
 0x4b7   : > { %v917_v31 = vsel %vm683_vm3, %v912_v30, 0 }
 0x4b8   : > { %1744 = vmatpush3.bf16.msra.mxu0 %v917_v31 }
 0x4b9   : > { %1755 = vmatprep.subr.bf16.mxu0 %v1969_v8 }
 0x4ba   : > { %v1031_v34 = vpop.permute.xlu1 %1030 }
 0x4bb   : > { %v1036_v37 = vsel %vm683_vm3, %v1031_v34, 0  ;;  %v1854_v34 = vld [vmem:[%s2348_s11 + $0x30] sm:$0xff]  }
 0x4c0   : > { %v1882_v32 = vpop.eup %1881 }
 0x4c1   : > { %v909_v33 = vmul.f32 %v1882_v32, %v1876_v14  ;;  %v1884_v36 = vpop.eup %1883 }
 0x4c2   : > { %v1028_v38 = vmul.f32 %v1884_v36, %v1874_v9  ;;  %v1856_v36 = vld [vmem:[%s2348_s11 + $0x28] sm:$0xff]  }
 0x4c3   : > { %v910_v35 = vpack.c.bf16 %v909_v33, %v909_v33  ;;  %v1853_v33 = vld [vmem:[%s2348_s11 + $0x70] sm:$0xff]  }
 0x4c4   : > { %v1029_v39 = vpack.c.bf16 %v1028_v38, %v1028_v38  ;;  %v1858_v38 = vld [vmem:[%s2348_s11 + $0x20] sm:$0xff]  }
 0x4c5   : > { %1746 = vmatmul.mubr.msk.bf16.vlgmr.msra.gmra.mxu0 %vm619_vm2, %v910_v35  ;;  %v1855_v35 = vld [vmem:[%s2348_s11 + $0x68] sm:$0xff]  }
 0x4c6   : > { %1756 = vmatpush3.bf16.msra.mxu0 %v1036_v37  ;;  %1757 = vmatprep.mubr.msk.bf16.mxu0 %vm1970_vm1, %v1969_v8  ;;  %v1857_v37 = vld [vmem:[%s2348_s11 + $0x60] sm:$0xff]  }
 0x4c7   : > { %1241 = vmatprep.subr.bf16.mxu0 %v1847_v16  ;;  %v1653_v16 = vld [vmem:[%s2349_s12] ss:$0 sm:$0xff] }
 0x4cd   : > { %1758 = vmatmul.mubr.msk.bf16.vlgmr.msra.gmra.mxu0 %vm619_vm2, %v1029_v39  ;;  %v1859_v39 = vld [vmem:[%s2348_s11 + $0x58] sm:$0xff]  }
 0x4ce   : > { %1261 = vmatprep.mubr.bf16.mxu0 %v1985_v19 }
 0x550   : > { %v721_v40 = vpop.f32.mrf.mxu0 }
 0x551   : > { %v727_v41 = vpack.c.bf16 %v721_v40, %v721_v40  ;;  %v1860_v40 = vld [vmem:[%s2348_s11 + $0x18] sm:$0xff]  }
 0x552   : > { %v1723_v42 = vpop.f32.mrf.mxu0 }
 0x553   : > { %729 = vst.msk [vmem:[#allocation5] sm:$0xf] %vm728_vm4, %v727_v41  ;;  %v1861_v41 = vld [vmem:[%s2348_s11 + $0x50] sm:$0xff]  }
 0x554   : > { %v724_v43 = vpop.f32.mrf.mxu0  ;;  %v1862_v42 = vld [vmem:[%s2348_s11 + $0x10] sm:$0xff]  }
 0x555   : > { %v1863_v43 = vld [vmem:[%s2348_s11 + $0x48] sm:$0xff]  }
 0x556   : > { %v1724_v44 = vpop.f32.mrf.mxu0 }
 0x557   : > { %v1864_v44 = vld [vmem:[%s2348_s11 + $0x8] sm:$0xff]  }
 0x55a   : > { %v834_v45 = vpop.f32.mrf.mxu0 }
 0x55b   : > { %v1658_v46 = vpack.c.bf16 %v834_v45, %v834_v45  ;;  %v1865_v45 = vld [vmem:[%s2348_s11 + $0x40] sm:$0xff]  }
 0x55c   : > { %v1735_v47 = vpop.f32.mrf.mxu0 }
 0x55d   : > { %844 = vrot.lane.b32.xlu0 %v1658_v46, %s1982_s17  ;;  %v1866_v46 = vld [vmem:[%s2348_s11] sm:$0xff]   ;;  %v1195_v47 = vlaneseq }
 0x55e   : > { %v837_v48 = vpop.f32.mrf.mxu0 }
 0x55f   : > { %v1196_v48 = vshrl.u32 %v1195_v47, 7 }
 0x560   : > { %v1736_v49 = vpop.f32.mrf.mxu0 }
 0x561   : > { %v1197_v49 = vsub.s32 0, %v1196_v48 }
 0x563   : > { %v1198_v52 = vrot.slane %v1193_v50, %v1197_v49 }
 0x585   : > { %v953_v51 = vpop.f32.mrf.mxu0 }
 0x586   : > { %v1659_v53 = vpack.c.bf16 %v953_v51, %v953_v51  ;;  %v1201_v51 = vsub.s32 1, %v1196_v48 }
 0x587   : > { %v1747_v54 = vpop.f32.mrf.mxu0 }
 0x588   : > { %963 = vrot.lane.b32.xlu1 %v1659_v53, %s1983_s14  ;;  %v1202_v53 = vrot.slane %v1193_v50, %v1201_v51  ;;  %s1895_s14 = sshll.u32 %s1986_s24, 4  ;;  %s1896_s14 = int_to_ptr.vmem [resolvable:$false] %s1895_s14 }
 0x589   : > { %v956_v55 = vpop.f32.mrf.mxu0  ;;  %s1897_s28 = scalar_lea.vmem %s1896_s14, 256 }
 0x58b   : > { %v1748_v56 = vpop.f32.mrf.mxu0 }
 0x58d   : > { %v1072_v57 = vpop.f32.mrf.mxu0 }
 0x58e   : > { %v1660_v58 = vpack.c.bf16 %v1072_v57, %v1072_v57 }
 0x58f   : > { %v1759_v59 = vpop.f32.mrf.mxu0 }
 0x590   : > { %1082 = vrot.lane.b32.xlu0 %v1660_v58, %s1984_s15  ;;  %s489_s15 = scalar_lea.vmem [#allocation6], %s1607_s23 }
 0x591   : > { %v1075_v60 = vpop.f32.mrf.mxu0  ;;  %s1490_s17 = sshll.u32 %s489_s15, 4  ;;  %s1491_s17 = int_to_ptr.vmem [resolvable:$true] %s1490_s17 }
 0x592   : > { %s1891_s4 = scalar_lea.vmem %s1491_s17, 128  ;;  %p1898_p1 = scmp.lt.s32.totalorder %s1491_s17, %s1896_s14 }
 0x593   : > { %v1760_v61 = vpop.f32.mrf.mxu0  ;;  %p1892_p12 = scmp.ne.s32.totalorder %s1491_s17, %s1891_s4  ;;  %p1899_p2 = scmp.lt.s32.totalorder %s1897_s28, %s1891_s4 }
 0x595   : > { %p1893_p13 = pnand %p1892_p12, %p2097_p4  ;;  %p1900_p3 = por %p1899_p2, %p1898_p1 }
 0x597   : > { %p1894_p0 = pneg %p1893_p13 }
 0x599   : > { %p1901_p5 = pnand %p1900_p3, %p1894_p0 }
 0x5cf   : > { %v845_v62 = vpop.permute.xlu0 %844 }
 0x5d0   : > { %848 = vst.msk [vmem:[#allocation5] sm:$0xf] %vm847_vm5, %v845_v62 }
 0x5fa   : > { %v964_v63 = vpop.permute.xlu1 %963 }
 0x5fb   : > { %967 = vst.msk [vmem:[#allocation5] sm:$0xf] %vm966_vm6, %v964_v63 }
 0x602   : > { %v1083_v8 = vpop.permute.xlu0 %1082 }
 0x603   : > { %1086 = vst.msk [vmem:[#allocation5] sm:$0xf] %vm1085_vm7, %v1083_v8 }
 0x60a   : > { %v1087_v1 = vld [vmem:[#allocation5] sm:$0xf] }
 0x60b   : > { %1766 = vmatmul.mubr.msk.bf16.vlgmr.msra.gmra.mxu1 %vm517_vm0, %v1087_v1 }
 0x60c   : > { %1684 = vmatpush3.bf16.msra.mxu1 %v1852_v21 }
 0x60d   : > { %1685 = vmatprep.subr.bf16.mxu1 %v1853_v33 }
 0x610   : > { %1686 = vmatpush3.bf16.msra.mxu1 %v1854_v34 }
 0x611   : > { %1687 = vmatprep.subr.bf16.mxu1 %v1855_v35 }
 0x614   : > { %1688 = vmatpush3.bf16.msra.mxu1 %v1856_v36 }
 0x615   : > { %1689 = vmatprep.subr.bf16.mxu1 %v1857_v37 }
 0x618   : > { %1690 = vmatpush3.bf16.msra.mxu1 %v1858_v38 }
 0x619   : > { %1691 = vmatprep.subr.bf16.mxu1 %v1859_v39 }
 0x61c   : > { %1692 = vmatpush3.bf16.msra.mxu1 %v1860_v40 }
 0x61d   : > { %1693 = vmatprep.subr.bf16.mxu1 %v1861_v41 }
 0x620   : > { %1694 = vmatpush3.bf16.msra.mxu1 %v1862_v42 }
 0x621   : > { %1695 = vmatprep.subr.bf16.mxu1 %v1863_v43 }
 0x624   : > { %1696 = vmatpush3.bf16.msra.mxu1 %v1864_v44 }
 0x625   : > { %1697 = vmatprep.subr.bf16.mxu1 %v1865_v45 }
 0x628   : > { %1698 = vmatpush3.bf16.msra.mxu1 %v1866_v46 }
 0x6cb   : > { %v1148_v3 = vpop.f32.mrf.mxu1 }
 0x6cc   : > { %v1149_v4 = vadd.f32 %v1626_v2, %v1148_v3 }
 0x6cd   : > { %v1767_v5 = vpop.f32.mrf.mxu1 }
 0x6ce   : > { %v1154_v6 = vadd.f32 %v1149_v4, %v2117_v0  ;;  %v1845_v0 = vld [vmem:[%s2346_s9 + $0x10] ss:$8 sps:$4 sm:$0xff]  }
 0x6cf   : > { %v1151_v7 = vpop.f32.mrf.mxu1  ;;  %1242 = vmatpush1.bf16.msra.mxu0 %v1845_v0 }
 0x6d0   : > { %1155 = vst.msk [vmem:[#allocation2] sm:$0xff] %vm517_vm0, %v1154_v6  ;;  %v1156_v9 = vsel %vm517_vm0, %v1154_v6, 0.0  ;;  %1243 = vmatprep.subr.bf16.mxu0 %v1850_v17 }
 0x6d1   : > { %1157 = vadd.xlane.f32.xlu1 %v1156_v9  ;;  %v1768_v10 = vpop.f32.mrf.mxu1 }
 0x6d3   : > { %1244 = vmatpush1.bf16.msra.mxu0 %v1848_v18 }
 0x75a   : > { %v1158_v11 = vpop.xlane.xlu1 %1157 }
 0x75b   : > { %v1159_v12 = vmul.f32 0.03125, %v1158_v11 }
 0x75d   : > { %v1160_v13 = vsub.f32 %v1154_v6, %v1159_v12 }
 0x75f   : > { %v1161_v14 = vmul.f32 %v1160_v13, %v1160_v13 }
 0x761   : > { %v1162_v15 = vsel %vm517_vm0, %v1161_v14, 0.0  ;;  %v1464_v14 = vld [vmem:[#allocation2] sm:$0xff] }
 0x762   : > { %1163 = vadd.xlane.f32.xlu0 %v1162_v15 }
 0x7eb   : > { %v1164_v22 = vpop.xlane.xlu0 %1163 }
 0x7ec   : > { %v1165_v23 = vmul.f32 0.03125, %v1164_v22 }
 0x7ee   : > { %v1166_v25 = vadd.f32 1e-05, %v1165_v23 }
 0x7f0   : > { %1885 = vrsqrt.f32 %v1166_v25 }
 0x7fd   : > { %v1886_v24 = vpop.eup %1885 }
 0x7fe   : > { %v1168_v27 = vmul.f32 %v1886_v24, %v1160_v13 }
 0x800   : > { %v1176_v29 = vmul.f32 %v1630_v26, %v1168_v27 }
 0x802   : > { %v1184_v30 = vadd.f32 %v1631_v28, %v1176_v29 }
 0x804   : > { %v1185_v31 = vpack.c.bf16 %v1184_v30, %v1184_v30 }
 0x806   : > { %1187 = vst.msk [vmem:[#allocation3] sm:$0xf] %vm1186_vm8, %v1185_v31 }
 0x80d   : > { %v1188_v32 = vld [vmem:[#allocation3] sm:$0xf] }
 0x80e   : > { %1636 = vmatmul.mubr.msk.bf16.vlgmr.msra.gmra.mxu0 %vm517_vm0, %v1188_v32 }
 0x8ce   : > { %v1263_v54 = vpop.f32.mrf.mxu0 }
 0x8cf   : > { %v1264_v55 = vadd.f32 %v1263_v54, %v1198_v52 }
 0x8d0   : > { %v1265_v56 = vpop.f32.mrf.mxu0 }
 0x8d1   : > { %v1272_v57 = vmul.f32 0.70710677, %v1264_v55  ;;  %v1266_v58 = vadd.f32 %v1265_v56, %v1202_v53  ;;  %v1270_v1 = vmul.f32 0.5, %v1264_v55 }
 0x8d2   : > { %v1267_v59 = vpop.f32.mrf.mxu0 }
 0x8d3   : > { %1887 = verf.f32 %v1272_v57  ;;  %v1273_v60 = vmul.f32 0.70710677, %v1266_v58  ;;  %v1271_v2 = vmul.f32 0.5, %v1266_v58 }
 0x8d4   : > { %v1268_v61 = vpop.f32.mrf.mxu0 }
 0x8d5   : > { %1889 = verf.f32 %v1273_v60 }
 0x8e0   : > { %v1888_v62 = vpop.eup %1887 }
 0x8e1   : > { %v1276_v63 = vadd.f32 1.0, %v1888_v62 }
 0x8e2   : > { %v1890_v8 = vpop.eup %1889 }
 0x8e3   : > { %v1277_v3 = vadd.f32 1.0, %v1890_v8  ;;  %v1278_v4 = vmul.f32 %v1276_v63, %v1270_v1 }
 0x8e5   : > { %v1279_v5 = vmul.f32 %v1277_v3, %v1271_v2  ;;  %v1280_v7 = vpack.c.bf16 %v1278_v4, %v1278_v4 }
 0x8e7   : > { %v1281_v6 = vpack.c.bf16 %v1279_v5, %v1279_v5 }
 0x8e9   : > { %1442 = vmatprep.mubr.bf16.mxu1 %v1281_v6 }
 0x8ea   : > { %1443 = vmatmul.mubr.bf16.vlgmr.msra.gmra.mxu1 %v1280_v7 }
 0x9aa   : > { %v1699_v9 = vpop.f32.mrf.mxu1 }
 0x9ac   : > { %v1700_v10 = vpop.f32.mrf.mxu1 }
 0x9ad   : > { %v1701_v11 = vadd.f32 %v1700_v10, %v1699_v9 }
 0x9ae   : > { %v1702_v12 = vpop.f32.mrf.mxu1 }
 0x9af   : > { %1453 = vst.msk [vmem:[#allocation4] sm:$0xff] %vm517_vm0, %v1701_v11 }
 0x9b0   : > { %v1703_v13 = vpop.f32.mrf.mxu1 }
 0x9b6   : > { %v1465_v15 = vld [vmem:[#allocation4] sm:$0xff] }
 0x9b7   : > { %v1466_v0 = vadd.f32 %v1465_v15, %v1464_v14 }
 0x9b9   : > { %v1474_v17 = vadd.f32 %v1653_v16, %v1466_v0 }
 0x9bb   : > { %1475 = vst.msk [vmem:[%s489_s15] sm:$0xff] %vm517_vm0, %v1474_v17 }
 0x9bc   : > { %1904 = shalt.err (!%p1901_p5)
}
 0x9bd   : > { %s1905_s23 = scalar_lea.hbm %s1488_s2, 128  ;;  %s1909_s15 = scalar_lea.hbm %s2350_s13, 256 }
 0x9be   : > { %p1906_p6 = scmp.ne.s32.totalorder %s1488_s2, %s1905_s23  ;;  %p1910_p10 = scmp.lt.s32.totalorder %s1488_s2, %s2350_s13 }
 0x9bf   : > { %p1911_p11 = scmp.lt.s32.totalorder %s1909_s15, %s1905_s23 }
 0x9c0   : > { %p1907_p7 = pnand %p1906_p6, %p2097_p4 }
 0x9c1   : > { %p1912_p12 = por %p1911_p11, %p1910_p10 }
 0x9c2   : > { %p1908_p9 = pneg %p1907_p7 }
 0x9c4   : > { %p1913_p13 = pnand %p1912_p12, %p1908_p9 }
 0x9c6   : > { %1916 = shalt.err (!%p1913_p13)
}
 0x9c7   : > { %1769 = dma.vmem_to_hbm [thread:$0]  (%p2097_p4), %s1491_s17, 128, %s1488_s2, %s1477_s3  }
 0x9c8 PF: > { %p1775_p0 = scmp.ge.s32.totalorder %s1967_s30, 2  ;;  %s1502_s4 = sand.u32 1, %s1947_s25  }
 0x9c9   : > { %s1503_s24 = scalar_lea.sflag [#allocation7], %s1502_s4 }
 0x9ca   : > { %p1772_p1 = pnand %p1775_p0, %p2104_p8 }
 0x9cc   : > { %p1773_p2 = pneg %p1772_p1 }
 0x9ce   : > { %1942 = dma.done.wait (%p1773_p2), %s1503_s24, 128  }
 0x9cf   : > { %1944 = vsyncadd (%p1773_p2), %s1503_s24, 4294967168  ;;  %s26_s30 = sadd.s32 1, %s1967_s30   ;;  %s2363_s25 = smov %s1951_s26 }
 0x9d0   : > { %p23_p3 = scmp.ge.s32.totalorder %s26_s30, 4   ;;  %s2364_s26 = smov %s1955_s27 }
 0x9d1   : > { %s2365_s27 = smov %s2110_s21  ;;  %s2366_s28 = smov %s1963_s29 }
 0x9d2   : > { %s2367_s29 = smov %s2369_s16  ;;  %25 = sbr.rel (!%p23_p3) target bundleno = 10 (0xa), region = 132 }
 0x9d7   :  { %1508 = vsyncpa [#allocation7], 1 }
 0x9d8   :  { %1510 = vsyncpa [#allocation7 + $0x1], 1 }

</bundles_post_ra>
